<compile_context>
chip_gen: v6e
topology: v6e:2x2x1
jax: 0.10.0
libtpu: 0.0.40
codegen_flags: <defaults>
</compile_context>

<pallas_src>
import jax
import jax.numpy as jnp
from jax.experimental import pallas as pl
from jax.experimental.pallas import tpu as pltpu

EPS = 1e-5


def _round_up(x, m):
    return (x + m - 1) // m * m


def _choose_tile(m, cap=2048):
    """Largest lane-dense tile (multiple of 128, <= cap) minimizing padded work."""
    best_t, best_total = 128, _round_up(m, 128)
    for t in range(128, cap + 1, 128):
        total = _round_up(m, t)
        if total < best_total or (total == best_total and t > best_t):
            best_t, best_total = t, total
    return best_t


# ------------- Phase 1: 1x1 conv (matmul) + per-channel sum / sumsq ----------
def _conv_stats_kernel(w_ref, x_ref, y_ref, sum_ref, sumsq_ref):
    # w_ref:     (Cout, Cin)
    # x_ref:     (Cin, tile_m)     -- lane-dense activation tile
    # y_ref:     (Cout, tile_m)    -- unnormalized conv output tile
    # sum_ref:   (Cout, 1)         -- resident accumulator across the grid
    # sumsq_ref: (Cout, 1)
    y = jnp.dot(w_ref[...], x_ref[...], preferred_element_type=jnp.float32)
    y_ref[...] = y

    @pl.when(pl.program_id(0) == 0)
    def _():
        sum_ref[...] = jnp.zeros_like(sum_ref)
        sumsq_ref[...] = jnp.zeros_like(sumsq_ref)

    sum_ref[...] += jnp.sum(y, axis=1, keepdims=True)
    sumsq_ref[...] += jnp.sum(y * y, axis=1, keepdims=True)


# ------------- Phase 2: per-channel affine  y*scale + shift ------------------
def _normalize_kernel(y_ref, scale_ref, shift_ref, o_ref):
    o_ref[...] = (y_ref[...] * scale_ref[...] + shift_ref[...]).astype(o_ref.dtype)


def conv2d_batchnorm(x_nchw, w_oihw, gamma, beta, *, tile_m=None):
    """x_nchw: (N, 96, H, W); w_oihw: (24, 96, 1, 1); gamma/beta: (24,)."""
    N, Cin, H, W = x_nchw.shape
    Cout = w_oihw.shape[0]
    M = N * H * W
    out_dtype = x_nchw.dtype

    if tile_m is None:
        tile_m = _choose_tile(M)
    tile_m = max(128, _round_up(tile_m, 128))
    M_pad = _round_up(M, tile_m)
    n_tiles = M_pad // tile_m

    # NCHW -> (Cin, M).  For N == 1 (the module's shape) this is a pure reshape.
    x_cm = jnp.transpose(x_nchw, (1, 0, 2, 3)).reshape(Cin, M).astype(jnp.float32)
    if M_pad != M:
        # Zero columns contribute 0 to sum and sumsq; stats divide by true M.
        x_cm = jnp.pad(x_cm, ((0, 0), (0, M_pad - M)))
    w_mat = w_oihw.reshape(Cout, Cin).astype(jnp.float32)

    # ---- Phase 1: y = W @ X (tiled over M) + per-channel sum / sumsq --------
    y, ch_sum, ch_sumsq = pl.pallas_call(
        _conv_stats_kernel,
        out_shape=(
            jax.ShapeDtypeStruct((Cout, M_pad), jnp.float32),
            jax.ShapeDtypeStruct((Cout, 1), jnp.float32),
            jax.ShapeDtypeStruct((Cout, 1), jnp.float32),
        ),
        grid=(n_tiles,),
        in_specs=[
            pl.BlockSpec((Cout, Cin), lambda i: (0, 0)),      # weight: loaded once
            pl.BlockSpec((Cin, tile_m), lambda i: (0, i)),    # activation tile
        ],
        out_specs=(
            pl.BlockSpec((Cout, tile_m), lambda i: (0, i)),   # unnormalized y
            pl.BlockSpec((Cout, 1), lambda i: (0, 0)),        # sum accumulator
            pl.BlockSpec((Cout, 1), lambda i: (0, 0)),        # sumsq accumulator
        ),
        compiler_params=pltpu.CompilerParams(
            dimension_semantics=("arbitrary",)),
        cost_estimate=pl.CostEstimate(
            flops=2 * M_pad * Cin * Cout + 4 * M_pad * Cout,
            transcendentals=0,
            bytes_accessed=4 * (M_pad * Cin + M_pad * Cout + Cin * Cout)),
    )(w_mat, x_cm)

    # ---- Tiny per-channel math (24 values) between the two phases -----------
    m_f = jnp.float32(M)
    mean = ch_sum / m_f
    var = ch_sumsq / m_f - mean * mean          # biased variance (training mode)
    inv_std = jax.lax.rsqrt(var + EPS)
    scale = gamma.reshape(Cout, 1).astype(jnp.float32) * inv_std
    shift = beta.reshape(Cout, 1).astype(jnp.float32) - mean * scale

    # ---- Phase 2: in-place normalize/affine over the (smaller) Cout=24 y ----
    io_alias = {0: 0} if jnp.dtype(out_dtype) == jnp.dtype(jnp.float32) else {}
    y_norm = pl.pallas_call(
        _normalize_kernel,
        out_shape=jax.ShapeDtypeStruct((Cout, M_pad), out_dtype),
        grid=(n_tiles,),
        in_specs=[
            pl.BlockSpec((Cout, tile_m), lambda i: (0, i)),
            pl.BlockSpec((Cout, 1), lambda i: (0, 0)),
            pl.BlockSpec((Cout, 1), lambda i: (0, 0)),
        ],
        out_specs=pl.BlockSpec((Cout, tile_m), lambda i: (0, i)),
        compiler_params=pltpu.CompilerParams(
            dimension_semantics=("parallel",)),
        cost_estimate=pl.CostEstimate(
            flops=2 * M_pad * Cout,
            transcendentals=0,
            bytes_accessed=8 * M_pad * Cout),
        input_output_aliases=io_alias,
    )(y, scale, shift)

    # (Cout, M) -> NCHW
    out_cm = y_norm[:, :M]
    return jnp.transpose(out_cm.reshape(Cout, N, H, W), (1, 0, 2, 3))


def reference(x_nchw, w_oihw, gamma, beta):
    """Plain-JAX reference for sanity checking."""
    N, Cin, H, W = x_nchw.shape
    Cout = w_oihw.shape[0]
    x2d = jnp.transpose(x_nchw, (0, 2, 3, 1)).reshape(-1, Cin).astype(jnp.float32)
    wmat = jnp.transpose(w_oihw.reshape(Cout, Cin), (1, 0)).astype(jnp.float32)
    y = x2d @ wmat
    mean = y.mean(axis=0, keepdims=True)
    var = ((y - mean) ** 2).mean(axis=0, keepdims=True)
    out = (y - mean) / jnp.sqrt(var + EPS) * gamma[None, :] + beta[None, :]
    return jnp.transpose(out.reshape(N, H, W, Cout), (0, 3, 1, 2))


if __name__ == "__main__":
    key = jax.random.PRNGKey(0)
    k_x, k_w, k_g, k_b = jax.random.split(key, 4)

    # Cin=96 / Cout=24 fixed by the module; small spatial extent instead of 56x56.
    N, Cin, H, W, Cout = 1, 96, 32, 32, 24
    x = jax.random.normal(k_x, (N, Cin, H, W), dtype=jnp.float32)
    w = jax.random.normal(k_w, (Cout, Cin, 1, 1), dtype=jnp.float32) * 0.1
    gamma = jax.random.normal(k_g, (Cout,), dtype=jnp.float32) * 0.1 + 1.0
    beta = jax.random.normal(k_b, (Cout,), dtype=jnp.float32) * 0.1

    # tile_m=256 -> 4 grid steps at M=1024: exercises the multi-tile
    # accumulation + pipelining path even at this small test shape.
    out = conv2d_batchnorm(x, w, gamma, beta, tile_m=256)
    jax.block_until_ready(out)

    ref = reference(x, w, gamma, beta)
    assert out.shape == (N, Cout, H, W)
    assert jnp.allclose(out, ref, atol=1e-3, rtol=1e-3), "mismatch vs reference"

    print("KERNEL_OK")
</pallas_src>

<mosaic_0001>
module attributes {stable_mosaic.version = 11 : i64} {
  func.func @_conv_stats_kernel(%arg0: i32, %arg1: memref<24x96xf32, #tpu.memory_space<vmem>>, %arg2: memref<96x256xf32, #tpu.memory_space<vmem>>, %arg3: memref<24x256xf32, #tpu.memory_space<vmem>>, %arg4: memref<24x1xf32, #tpu.memory_space<vmem>>, %arg5: memref<24x1xf32, #tpu.memory_space<vmem>>) attributes {dimension_semantics = [#tpu.dimension_semantics<arbitrary>], iteration_bounds = array<i64: 4>, scalar_prefetch = 0 : i64, scratch_operands = 0 : i64, tpu.core_type = #tpu.core_type<tc>, window_params = [{pipeline_mode = #tpu.pipeline_mode<synchronous>, transform_indices = @transform_0, window_bounds = array<i64: 24, 96>}, {transform_indices = @transform_1, window_bounds = array<i64: 96, 256>}, {transform_indices = @transform_2, window_bounds = array<i64: 24, 256>}, {pipeline_mode = #tpu.pipeline_mode<synchronous>, transform_indices = @transform_3, window_bounds = array<i64: 24, 1>}, {pipeline_mode = #tpu.pipeline_mode<synchronous>, transform_indices = @transform_4, window_bounds = array<i64: 24, 1>}]} {
    %c0 = arith.constant 0 : index
    %c0_0 = arith.constant 0 : index
    %0 = vector.load %arg1[%c0, %c0_0] : memref<24x96xf32, #tpu.memory_space<vmem>>, vector<24x96xf32>
    %c0_1 = arith.constant 0 : index
    %c0_2 = arith.constant 0 : index
    %1 = vector.load %arg2[%c0_1, %c0_2] : memref<96x256xf32, #tpu.memory_space<vmem>>, vector<96x256xf32>
    %cst = arith.constant dense<0.000000e+00> : vector<24x256xf32>
    %2 = tpu.matmul %0, %1, %cst {dimension_numbers = #tpu.dot_dimension_numbers<[1], [0], [0], [1], [0, 0, 1, 1], [], []>} : vector<24x96xf32>, vector<96x256xf32>, vector<24x256xf32> -> vector<24x256xf32>
    %c0_3 = arith.constant 0 : index
    %c0_4 = arith.constant 0 : index
    %3 = vector.load %arg3[%c0_3, %c0_4] : memref<24x256xf32, #tpu.memory_space<vmem>>, vector<24x256xf32>
    tpu.vector_store %arg3[%c0_3, %c0_4], %2 {strides = array<i32>} : memref<24x256xf32, #tpu.memory_space<vmem>>, vector<24x256xf32>,
    %c0_i32 = arith.constant 0 : i32
    %4 = arith.cmpi eq, %arg0, %c0_i32 : i32
    %5 = arith.extui %4 : i1 to i32
    %c0_i32_5 = arith.constant 0 : i32
    %6 = arith.cmpi ne, %5, %c0_i32_5 : i32
    scf.if %6 {
      %cst_16 = arith.constant 0.000000e+00 : f32
      %18 = vector.broadcast %cst_16 : f32 to vector<24x1xf32>
      %c0_17 = arith.constant 0 : index
      %c0_18 = arith.constant 0 : index
      %19 = vector.load %arg4[%c0_17, %c0_18] : memref<24x1xf32, #tpu.memory_space<vmem>>, vector<24x1xf32>
      tpu.vector_store %arg4[%c0_17, %c0_18], %18 {strides = array<i32>} : memref<24x1xf32, #tpu.memory_space<vmem>>, vector<24x1xf32>,
      %cst_19 = arith.constant 0.000000e+00 : f32
      %20 = vector.broadcast %cst_19 : f32 to vector<24x1xf32>
      %c0_20 = arith.constant 0 : index
      %c0_21 = arith.constant 0 : index
      %21 = vector.load %arg5[%c0_20, %c0_21] : memref<24x1xf32, #tpu.memory_space<vmem>>, vector<24x1xf32>
      tpu.vector_store %arg5[%c0_20, %c0_21], %20 {strides = array<i32>} : memref<24x1xf32, #tpu.memory_space<vmem>>, vector<24x1xf32>,
    } else {
    }
    %c0_6 = arith.constant 0 : index
    %c0_7 = arith.constant 0 : index
    %7 = vector.load %arg4[%c0_6, %c0_7] : memref<24x1xf32, #tpu.memory_space<vmem>>, vector<24x1xf32>
    %cst_8 = arith.constant dense<0.000000e+00> : vector<24xf32>
    %8 = vector.multi_reduction <add>, %2, %cst_8 [1] : vector<24x256xf32> to vector<24xf32>
    %9 = vector.shape_cast %8 : vector<24xf32> to vector<24x1xf32>
    %10 = arith.addf %7, %9 : vector<24x1xf32>
    %c0_9 = arith.constant 0 : index
    %c0_10 = arith.constant 0 : index
    %11 = vector.load %arg4[%c0_9, %c0_10] : memref<24x1xf32, #tpu.memory_space<vmem>>, vector<24x1xf32>
    tpu.vector_store %arg4[%c0_9, %c0_10], %10 {strides = array<i32>} : memref<24x1xf32, #tpu.memory_space<vmem>>, vector<24x1xf32>,
    %c0_11 = arith.constant 0 : index
    %c0_12 = arith.constant 0 : index
    %12 = vector.load %arg5[%c0_11, %c0_12] : memref<24x1xf32, #tpu.memory_space<vmem>>, vector<24x1xf32>
    %13 = arith.mulf %2, %2 : vector<24x256xf32>
    %cst_13 = arith.constant dense<0.000000e+00> : vector<24xf32>
    %14 = vector.multi_reduction <add>, %13, %cst_13 [1] : vector<24x256xf32> to vector<24xf32>
    %15 = vector.shape_cast %14 : vector<24xf32> to vector<24x1xf32>
    %16 = arith.addf %12, %15 : vector<24x1xf32>
    %c0_14 = arith.constant 0 : index
    %c0_15 = arith.constant 0 : index
    %17 = vector.load %arg5[%c0_14, %c0_15] : memref<24x1xf32, #tpu.memory_space<vmem>>, vector<24x1xf32>
    tpu.vector_store %arg5[%c0_14, %c0_15], %16 {strides = array<i32>} : memref<24x1xf32, #tpu.memory_space<vmem>>, vector<24x1xf32>,
    return
  }
  func.func @transform_0(%arg0: i32) -> (i32, i32) {
    %c0_i32 = arith.constant 0 : i32
    %c0_i32_0 = arith.constant 0 : i32
    %c0_i32_1 = arith.constant 0 : i32
    return %c0_i32, %c0_i32_0 : i32, i32
  }
  func.func @transform_1(%arg0: i32) -> (i32, i32) {
    %c0_i32 = arith.constant 0 : i32
    %c0_i32_0 = arith.constant 0 : i32
    return %c0_i32, %arg0 : i32, i32
  }
  func.func @transform_2(%arg0: i32) -> (i32, i32) {
    %c0_i32 = arith.constant 0 : i32
    %c0_i32_0 = arith.constant 0 : i32
    return %c0_i32, %arg0 : i32, i32
  }
  func.func @transform_3(%arg0: i32) -> (i32, i32) {
    %c0_i32 = arith.constant 0 : i32
    %c0_i32_0 = arith.constant 0 : i32
    %c0_i32_1 = arith.constant 0 : i32
    return %c0_i32, %c0_i32_0 : i32, i32
  }
  func.func @transform_4(%arg0: i32) -> (i32, i32) {
    %c0_i32 = arith.constant 0 : i32
    %c0_i32_0 = arith.constant 0 : i32
    %c0_i32_1 = arith.constant 0 : i32
    return %c0_i32, %c0_i32_0 : i32, i32
  }
}

</mosaic_0001>

<bundles_post_ra>
// kernel: tpu_custom_call.1
= control target key start
LH: loop header
LB: loop body
LE: loop exit
PB: predicated region body
PF: predicated region fallthrough
CT: control target
= control target key end

     0   :  { %10 = vsyncpa [#allocation3], 0  ;;  %s1076_s0 = inlined_call_operand.hbm [shape: f32[24,96], index: 0, kind: input, shape index: {}]   ;;  %s1077_s1 = inlined_call_operand.hbm [shape: f32[96,1024], index: 1, kind: input, shape index: {}]   ;;  %s1078_s2 = inlined_call_operand.hbm [shape: f32[24,1024], index: 2, kind: output, shape index: {0}]   ;;  %s1079_s3 = inlined_call_operand.vmem [shape: f32[24,1], index: 3, kind: output, shape index: {1}]   ;;  %s1080_s4 = inlined_call_operand.vmem [shape: f32[24,1], index: 4, kind: output, shape index: {2}]  }
   0x1   :  { %11 = vsyncpa [#allocation6], 0 }
   0x2   :  { %13 = vsyncpa [#allocation6 + $0x1], 0 }
   0x3   :  { %14 = vsyncpa [#allocation4], 0 }
   0x4   :  { %16 = vsyncpa [#allocation4 + $0x1], 0  ;;  %s793_s15 = smov 0   ;;  %s795_s16 = smov 0  }
   0x5   :  { %s797_s17 = smov 0   ;;  %s799_s18 = smov 0  }
   0x6 LB: > { %s814_s19 = sadd.s32 4294967295, %s753_s18   ;;  %s519_s20 = sadd.s32 4294967294, %s753_s18   ;;  %s753_s18 = sphi %s799_s18, %s1102_s18   ;;  %s749_s17 = sphi %s797_s17, %s1101_s17   ;;  %s745_s16 = sphi %s795_s16, %s1100_s16   ;;  %s741_s15 = sphi %s793_s15, %s1099_s15  }
   0x7   : > { %s818_s21 = sadd.s32 1, %s753_s18   ;;  %s50_s22 = sadd.s32 1, %s749_s17 }
   0x8   : > { %s47_s23 = ssub.s32 %s753_s18, %s818_s21  ;;  %p57_p0 = scmp.ne.s32.totalorder %s749_s17, %s745_s16 }
   0x9   : > { %p48_p1 = scmp.eq.s32.totalorder %s47_s23, 0  ;;  %p58_p2 = scmp.eq.s32.totalorder %s753_s18, 0 }
   0xa   : > { %p63_p3 = scmp.ne.s32.totalorder %s745_s16, %s741_s15  ;;  %p1083_p4 = scmp.eq.s32.totalorder %s814_s19, 0 }
   0xb   : > { %s830_s24 = scalar_select %p48_p1, %s749_s17, %s50_s22  }
   0xc   : > { %p832_p5 = por %p58_p2, %p57_p0  ;;  %p838_p6 = por %p1083_p4, %p63_p3 }
   0xd   : > { %p87_p7 = scmp.eq.s32.totalorder %s814_s19, 3  ;;  %p93_p8 = scmp.eq.s32.totalorder %s519_s20, 3 }
   0xe   : > { %s1086_s26 = scalar_select %p838_p6, 1, 0 }
   0xf   : > { %p520_p9 = scmp.ge.s32.totalorder %s753_s18, 1  ;;  %p142_p10 = scmp.lt.s32.totalorder %s753_s18, 5 }
  0x10   : > { %p845_p11 = por %p87_p7, %p57_p0  ;;  %p849_p12 = por %p93_p8, %p63_p3 }
  0x11   : > { %p853_p13 = pnand %p520_p9, %p142_p10  ;;  %s755_s30 = smov [#allocation2]  }
  0x12   : > { %s1087_s27 = scalar_select %p845_p11, 1, 0 }
  0x13   : > { %s1088_s28 = scalar_select %p849_p12, 1, 0 }
  0x14   : > { %s1089_s29 = scalar_select %p853_p13, 1, 0 }
  0x15   : > { %p572_p2 = pneg %p853_p13  ;;  %s154_s5 = sshll.u32 %s755_s30, 4  ;;  %s155_s5 = int_to_ptr.vmem [resolvable:$true] %s154_s5 }
  0x16   : > { %p585_p3 = scmp.lt.s32.totalorder %s753_s18, 4  ;;  %s168_s7 = sand.u32 1, %s749_s17  }
  0x17   : > { %p862_p0 = pnand %p572_p2, %p1083_p4  ;;  %s642_s8 = scalar_lea.vmem %s155_s5, 384 }
  0x18   : > { %p643_p8 = scmp.ne.s32.totalorder %s155_s5, %s642_s8  ;;  %p650_p1 = scmp.lt.s32.totalorder %s155_s5, %s155_s5 }
  0x19   : > { %p633_p7 = pneg %p862_p0  ;;  %p651_p12 = scmp.lt.s32.totalorder %s642_s8, %s642_s8 }
  0x1b   : > { %p645_p9 = pnand %p643_p8, %p633_p7  ;;  %p652_p11 = por %p651_p12, %p650_p1 }
  0x1d   : > { %p646_p10 = pneg %p645_p9 }
  0x1f   : > { %p653_p6 = pnand %p652_p11, %p646_p10 }
  0x21   : > { %656 = shalt.err (!%p653_p6)
}
  0x22   : > { %s756_s9 = smov 128   ;;  %s757_s10 = smov 8  }
  0x23   : > { %575 = dma.hbm_to_vmem [thread:$0]  (!%p862_p0), %s1076_s0, 384, %s155_s5, [#allocation3], %s756_s9, %s756_s9, %s757_s10  }
  0x24   : > { %p879_p2 = pnand %p585_p3, %p832_p5  ;;  %s561_s14 = smul.u32 192, %s168_s7 }
  0x25   : > { %s535_s20 = sshll.u32 %s753_s18, 8  ;;  %s891_s25 = scalar_lea.sflag [#allocation6], %s168_s7 }
  0x26   : > { %s887_s30 = scalar_lea.hbm %s1077_s1, %s535_s20  ;;  %s172_s6 = scalar_lea.vmem [#allocation5], %s561_s14 }
  0x27   : > { %s179_s8 = sshll.u32 %s172_s6, 4  ;;  %s657_s5 = scalar_lea.hbm %s887_s30, 3072  ;;  %s889_s8 = int_to_ptr.vmem [resolvable:$true] %s179_s8 }
  0x28   : > { %p658_p5 = scmp.ne.s32.totalorder %s887_s30, %s657_s5  ;;  %p659_p6 = pneg %p879_p2 }
  0x29   : > { %s662_s11 = scalar_lea.hbm %s1077_s1, 12288  ;;  %p663_p1 = scmp.lt.s32.totalorder %s887_s30, %s1077_s1 }
  0x2a   : > { %p660_p11 = pnand %p659_p6, %p658_p5  ;;  %p664_p0 = scmp.lt.s32.totalorder %s662_s11, %s657_s5 }
  0x2c   : > { %p661_p12 = pneg %p660_p11  ;;  %p665_p3 = por %p664_p0, %p663_p1 }
  0x2e   : > { %p666_p7 = pnand %p665_p3, %p661_p12 }
  0x30   : > { %669 = shalt.err (!%p666_p7)
}
  0x31   : > { %s670_s7 = scalar_lea.vmem %s889_s8, 3072  ;;  %s758_s14 = smov [#allocation5]  }
  0x32   : > { %p671_p8 = scmp.ne.s32.totalorder %s889_s8, %s670_s7  ;;  %s675_s22 = sshll.u32 %s758_s14, 4  ;;  %s676_s22 = int_to_ptr.vmem [resolvable:$false] %s675_s22 }
  0x33   : > { %s677_s23 = scalar_lea.vmem %s676_s22, 6144  ;;  %p678_p5 = scmp.lt.s32.totalorder %s889_s8, %s676_s22 }
  0x34   : > { %p673_p9 = pnand %p671_p8, %p659_p6  ;;  %p679_p11 = scmp.lt.s32.totalorder %s677_s23, %s670_s7 }
  0x36   : > { %p674_p10 = pneg %p673_p9  ;;  %p680_p4 = por %p679_p11, %p678_p5 }
  0x38   : > { %p681_p13 = pnand %p680_p4, %p674_p10 }
  0x3a   : > { %684 = shalt.err (!%p681_p13)
}
  0x3b   : > { %s759_s6 = smov 1024   ;;  %s760_s5 = smov 256  }
  0x3c   : > { %s761_s9 = smov 16   ;;  %p1092_p6 = scmp.ne.s32.totalorder %s1089_s29, 0 }
  0x3d   : > { %579 = dma.hbm_to_vmem [thread:$0]  (!%p879_p2), %s887_s30, 3072, %s889_s8, %s891_s25, %s759_s6, %s760_s5, %s761_s9  }
  0x3e   : > { %191 = sbr.rel (%p1092_p6) target bundleno = 454 (0x1c6), region = 28  ;;  %p1093_p12 = scmp.eq.s32.totalorder (!%p1092_p6), %s814_s19, 0 }
  0x43   : > { %728 = dma.done.wait (%p1093_p12), [#allocation3], 384   ;;  %p1094_p1 = pmov %p1093_p12 }
  0x44   : > { %s919_s10 = sand.u32 1, %s745_s16   ;;  %p1095_p4 = scmp.ne.s32.totalorder %s1086_s26, 0 }
  0x45   : > { %730 = vsyncadd (%p1094_p1), [#allocation3], 4294966912  ;;  %s562_s11 = smul.u32 192, %s919_s10  ;;  %s198_s12 = scalar_lea.sflag [#allocation6], %s919_s10 }
  0x47   : > { %s923_s20 = scalar_lea.vmem [#allocation5], %s562_s11 }
  0x48   : > { %732 = dma.done.wait (%p1095_p4), %s198_s12, 3072  }
  0x49   : > { %734 = vsyncadd (%p1095_p4), %s198_s12, 4294964224  ;;  %v762_v0 = vmov 0.0   ;;  %v254_v1 = vld [vmem:[%s923_s20 + $0xb8] sm:$0xff]  ;;  %v253_v2 = vld [vmem:[%s923_s20 + $0xb0] sm:$0xff]  ;;  %vm255_vm0 = vcmask 785408   ;;  %s563_s26 = smul.u32 48, %s919_s10 }
  0x4a   : > { %335 = vmatprep.mubr.f32.mxu1 %v762_v0  ;;  %329 = vmatprep.mubr.f32.mxu0 %v762_v0  ;;  %v252_v3 = vld [vmem:[%s923_s20 + $0xa8] sm:$0xff]  ;;  %v251_v4 = vld [vmem:[%s923_s20 + $0xa0] sm:$0xff]  ;;  %v250_v5 = vld [vmem:[%s923_s20 + $0x98] sm:$0xff]  ;;  %p1096_p13 = scmp.ne.s32.totalorder %s814_s19, 0 }
  0x4b   : > { %537 = vmatprep.subr.mxu1 %v254_v1  ;;  %273 = vmatprep.subr.mxu0 %v254_v1  ;;  %v249_v6 = vld [vmem:[%s923_s20 + $0x90] sm:$0xff]  ;;  %v248_v7 = vld [vmem:[%s923_s20 + $0x88] sm:$0xff]  ;;  %v247_v8 = vld [vmem:[%s923_s20 + $0x80] sm:$0xff]  ;;  %s957_s29 = scalar_lea.vmem [#allocation7], %s563_s26 }
  0x4c   : > { %549 = vmatpush1.msra.mxu1 %v253_v2  ;;  %274 = vmatpush1.msra.mxu0 %v253_v2  ;;  %v246_v9 = vld [vmem:[%s923_s20 + $0x78] sm:$0xff]  ;;  %v245_v10 = vld [vmem:[%s923_s20 + $0x70] sm:$0xff]  ;;  %v244_v11 = vld [vmem:[%s923_s20 + $0x68] sm:$0xff] }
  0x4d   : > { %538 = vmatprep.subr.mxu1 %v252_v3  ;;  %275 = vmatprep.subr.mxu0 %v252_v3  ;;  %v243_v12 = vld [vmem:[%s923_s20 + $0x60] sm:$0xff]  ;;  %v242_v13 = vld [vmem:[%s923_s20 + $0x58] sm:$0xff]  ;;  %v241_v14 = vld [vmem:[%s923_s20 + $0x50] sm:$0xff] }
  0x4e   : > { %550 = vmatpush1.msra.mxu1 %v251_v4  ;;  %276 = vmatpush1.msra.mxu0 %v251_v4  ;;  %v240_v15 = vld [vmem:[%s923_s20 + $0x48] sm:$0xff]  ;;  %v239_v16 = vld [vmem:[%s923_s20 + $0x40] sm:$0xff]  ;;  %v238_v17 = vld [vmem:[%s923_s20 + $0x38] sm:$0xff] }
  0x4f   : > { %539 = vmatprep.subr.mxu1 %v250_v5  ;;  %277 = vmatprep.subr.mxu0 %v250_v5  ;;  %v237_v18 = vld [vmem:[%s923_s20 + $0x30] sm:$0xff]  ;;  %v236_v19 = vld [vmem:[%s923_s20 + $0x28] sm:$0xff]  ;;  %v235_v20 = vld [vmem:[%s923_s20 + $0x20] sm:$0xff] }
  0x50   : > { %551 = vmatpush1.msra.mxu1 %v249_v6  ;;  %278 = vmatpush1.msra.mxu0 %v249_v6  ;;  %v234_v21 = vld [vmem:[%s923_s20 + $0x18] sm:$0xff]  ;;  %v233_v22 = vld [vmem:[%s923_s20 + $0x10] sm:$0xff]  ;;  %v232_v23 = vld [vmem:[%s923_s20 + $0x8] sm:$0xff] }
  0x51   : > { %540 = vmatprep.subr.mxu1 %v248_v7  ;;  %279 = vmatprep.subr.mxu0 %v248_v7  ;;  %v231_v24 = vld [vmem:[%s923_s20] sm:$0xff]  ;;  %v229_v25 = vld [vmem:[#allocation2 + $0x8] sm:$0xff]  ;;  %v228_v26 = vld [vmem:[#allocation2] sm:$0xff] }
  0x52   : > { %552 = vmatpush1.msra.mxu1 %v247_v8  ;;  %280 = vmatpush1.msra.mxu0 %v247_v8  ;;  %v230_v27 = vld [vmem:[#allocation2 + $0x10] sm:$0xff] }
  0x53   : > { %541 = vmatprep.subr.mxu1 %v246_v9  ;;  %281 = vmatprep.subr.mxu0 %v246_v9 }
  0x54   : > { %553 = vmatpush1.msra.mxu1 %v245_v10  ;;  %282 = vmatpush1.msra.mxu0 %v245_v10 }
  0x55   : > { %542 = vmatprep.subr.mxu1 %v244_v11  ;;  %283 = vmatprep.subr.mxu0 %v244_v11 }
  0x56   : > { %554 = vmatpush1.msra.mxu1 %v243_v12  ;;  %284 = vmatpush1.msra.mxu0 %v243_v12 }
  0x57   : > { %543 = vmatprep.subr.mxu1 %v242_v13  ;;  %285 = vmatprep.subr.mxu0 %v242_v13 }
  0x58   : > { %555 = vmatpush1.msra.mxu1 %v241_v14  ;;  %286 = vmatpush1.msra.mxu0 %v241_v14 }
  0x59   : > { %544 = vmatprep.subr.mxu1 %v240_v15  ;;  %287 = vmatprep.subr.mxu0 %v240_v15 }
  0x5a   : > { %556 = vmatpush1.msra.mxu1 %v239_v16  ;;  %288 = vmatpush1.msra.mxu0 %v239_v16 }
  0x5b   : > { %545 = vmatprep.subr.mxu1 %v238_v17  ;;  %289 = vmatprep.subr.mxu0 %v238_v17 }
  0x5c   : > { %557 = vmatpush1.msra.mxu1 %v237_v18  ;;  %290 = vmatpush1.msra.mxu0 %v237_v18 }
  0x5d   : > { %546 = vmatprep.subr.mxu1 %v236_v19  ;;  %291 = vmatprep.subr.mxu0 %v236_v19 }
  0x5e   : > { %558 = vmatpush1.msra.mxu1 %v235_v20  ;;  %292 = vmatpush1.msra.mxu0 %v235_v20 }
  0x5f   : > { %547 = vmatprep.subr.mxu1 %v234_v21  ;;  %293 = vmatprep.subr.mxu0 %v234_v21 }
  0x60   : > { %559 = vmatpush1.msra.mxu1 %v233_v22  ;;  %294 = vmatpush1.msra.mxu0 %v233_v22 }
  0x61   : > { %548 = vmatprep.subr.mxu1 %v232_v23  ;;  %295 = vmatprep.subr.mxu0 %v232_v23 }
  0x62   : > { %560 = vmatpush1.msra.mxu1 %v231_v24  ;;  %296 = vmatpush1.msra.mxu0 %v231_v24 }
  0x63   : > { %528 = vmatmul.mubr.msk.f32.vlgmr.msra.gmra.mxu1 %vm255_vm0, %v229_v25  ;;  %527 = vmatmul.mubr.msk.f32.vlgmr.msra.gmra.mxu0 %vm255_vm0, %v228_v26 }
  0x64   : > { %341 = vmatprep.mubr.f32.mxu1 %v762_v0 }
  0x67   : > { %529 = vmatmul.mubr.msk.f32.gmra.mxu1 %vm255_vm0, %v230_v27 }
 0x123   : > { %v337_v28 = vpop.f32.mrf.mxu1  ;;  %v331_v29 = vpop.f32.mrf.mxu0 }
 0x124   : > { %350 = vst [vmem:[%s957_s29 + $0x10] sm:$0xff] %v337_v28  ;;  %348 = vst [vmem:[%s957_s29] sm:$0xff] %v331_v29 }
 0x125   : > { %v339_v30 = vpop.f32.mrf.mxu1  ;;  %v333_v31 = vpop.f32.mrf.mxu0 }
 0x126   : > { %351 = vst [vmem:[%s957_s29 + $0x18] sm:$0xff] %v339_v30  ;;  %349 = vst [vmem:[%s957_s29 + $0x8] sm:$0xff] %v333_v31  ;;  %357 = sbr.rel (%p1096_p13) target bundleno = 303 (0x12f), region = 40 }
 0x127   : > { %v343_v32 = vpop.f32.mrf.mxu1 }
 0x128   : > { %352 = vst [vmem:[%s957_s29 + $0x20] sm:$0xff] %v343_v32 }
 0x129   : > { %v345_v33 = vpop.f32.mrf.mxu1 }
 0x12a   : > { %353 = vst [vmem:[%s957_s29 + $0x28] sm:$0xff] %v345_v33 }
 0x12b   : > { %vm358_vm1 = vcmask 7168   ;;  %v763_v34 = vmov 0.0  }
 0x12c   : > { %359 = vst.msk [vmem:[%s1079_s3] sm:$0xff] %vm358_vm1, %v763_v34  ;;  %360 = vst.msk [vmem:[%s1079_s3 + $0x8] sm:$0xff] %vm358_vm1, %v763_v34 }
 0x12d   : > { %361 = vst.msk [vmem:[%s1079_s3 + $0x10] sm:$0xff] %vm358_vm1, %v763_v34  ;;  %362 = vst.msk [vmem:[%s1080_s4] sm:$0xff] %vm358_vm1, %v763_v34 }
 0x12e   : > { %363 = vst.msk [vmem:[%s1080_s4 + $0x8] sm:$0xff] %vm358_vm1, %v763_v34  ;;  %364 = vst.msk [vmem:[%s1080_s4 + $0x10] sm:$0xff] %vm358_vm1, %v763_v34 }
 0x12f PF: > { %v374_v35 = vadd.f32 %v345_v33, %v343_v32  ;;  %v368_v36 = vadd.f32 %v333_v31, %v331_v29  ;;  %v387_v37 = vmul.f32 %v331_v29, %v331_v29  ;;  %v388_v38 = vmul.f32 %v333_v31, %v333_v31  ;;  %s536_s12 = sshll.u32 %s814_s19, 8  ;;  %s422_s20 = sshll.u32 %s957_s29, 4  ;;  %s992_s20 = int_to_ptr.vmem [resolvable:$true] %s422_s20 }
 0x130   : > { %v371_v39 = vadd.f32 %v339_v30, %v337_v28  ;;  %v391_v40 = vmul.f32 %v343_v32, %v343_v32  ;;  %v392_v41 = vmul.f32 %v345_v33, %v345_v33  ;;  %v389_v43 = vmul.f32 %v337_v28, %v337_v28  ;;  %s990_s30 = scalar_lea.hbm %s1078_s2, %s536_s12  ;;  %s409_s8 = scalar_lea.sflag [#allocation4], %s919_s10 }
 0x131   : > { %375 = vadd.xlane.f32.xlu1 %v374_v35  ;;  %369 = vadd.xlane.f32.xlu0 %v368_v36  ;;  %v393_v42 = vadd.f32 %v388_v38, %v387_v37  ;;  %v390_v44 = vmul.f32 %v339_v30, %v339_v30  ;;  %s685_s25 = scalar_lea.vmem %s992_s20, 768  ;;  %p1097_p0 = scmp.ne.s32.totalorder %s1087_s27, 0 }
 0x132   : > { %v399_v45 = vadd.f32 %v392_v41, %v391_v40  ;;  %p686_p2 = scmp.ne.s32.totalorder %s992_s20, %s685_s25  ;;  %s764_s7 = smov [#allocation7]  }
 0x133   : > { %v396_v46 = vadd.f32 %v390_v44, %v389_v43  ;;  %s689_s14 = sshll.u32 %s764_s7, 4  ;;  %s690_s14 = int_to_ptr.vmem [resolvable:$false] %s689_s14 }
 0x134   : > { %p687_p3 = pnand %p686_p2, %p1097_p0  ;;  %s691_s19 = scalar_lea.vmem %s690_s14, 1536 }
 0x135   : > { %394 = vadd.xlane.f32.xlu1 %v393_v42  ;;  %372 = vadd.xlane.f32.xlu0 %v371_v39  ;;  %p692_p8 = scmp.lt.s32.totalorder %s992_s20, %s690_s14  ;;  %p693_p9 = scmp.lt.s32.totalorder %s691_s19, %s685_s25 }
 0x136   : > { %p688_p7 = pneg %p687_p3 }
 0x137   : > { %p694_p10 = por %p693_p9, %p692_p8 }
 0x139   : > { %400 = vadd.xlane.f32.xlu1 %v399_v45  ;;  %397 = vadd.xlane.f32.xlu0 %v396_v46  ;;  %p695_p5 = pnand %p694_p10, %p688_p7 }
 0x13b   : > { %698 = shalt.err (!%p695_p5)
}
 0x13c   : > { %s699_s29 = scalar_lea.hbm %s990_s30, 768  ;;  %s703_s6 = scalar_lea.hbm %s1078_s2, 3072 }
 0x13d   : > { %p700_p11 = scmp.ne.s32.totalorder %s990_s30, %s699_s29  ;;  %p704_p1 = scmp.lt.s32.totalorder %s990_s30, %s1078_s2 }
 0x13e   : > { %p705_p4 = scmp.lt.s32.totalorder %s703_s6, %s699_s29 }
 0x13f   : > { %p701_p6 = pnand %p700_p11, %p1097_p0 }
 0x140   : > { %p706_p13 = por %p705_p4, %p704_p1 }
 0x141   : > { %p702_p12 = pneg %p701_p6 }
 0x143   : > { %p707_p2 = pnand %p706_p13, %p702_p12 }
 0x145   : > { %710 = shalt.err (!%p707_p2)
}
 0x146   : > { %s765_s11 = smov 256   ;;  %s766_s12 = smov 1024   ;;  %v367_v47 = vld [vmem:[%s1079_s3 + $0x10] sm:$0xff]  ;;  %v365_v48 = vld [vmem:[%s1079_s3] sm:$0xff]  ;;  %vm380_vm2 = vcmask 7168   ;;  %v366_v54 = vld [vmem:[%s1079_s3 + $0x8] sm:$0xff] }
 0x147   : > { %s767_s26 = smov 16   ;;  %v384_v53 = vld [vmem:[%s1080_s4] sm:$0xff]  ;;  %v386_v59 = vld [vmem:[%s1080_s4 + $0x10] sm:$0xff]  ;;  %v385_v60 = vld [vmem:[%s1080_s4 + $0x8] sm:$0xff] }
 0x148   : > { %570 = dma.vmem_to_hbm [thread:$0]  (%p1097_p0), %s992_s20, 768, %s990_s30, %s409_s8, %s765_s11, %s766_s12, %s767_s26  }
 0x1ba   : > { %v376_v49 = vpop.xlane.xlu1 %375  ;;  %v370_v50 = vpop.xlane.xlu0 %369 }
 0x1bb   : > { %v379_v51 = vadd.f32 %v376_v49, %v367_v47  ;;  %v377_v52 = vadd.f32 %v370_v50, %v365_v48 }
 0x1bd   : > { %383 = vst.msk [vmem:[%s1079_s3 + $0x10] sm:$0xff] %vm380_vm2, %v379_v51  ;;  %381 = vst.msk [vmem:[%s1079_s3] sm:$0xff] %vm380_vm2, %v377_v52 }
 0x1be   : > { %v395_v55 = vpop.xlane.xlu1 %394  ;;  %v373_v56 = vpop.xlane.xlu0 %372 }
 0x1bf   : > { %v402_v57 = vadd.f32 %v395_v55, %v384_v53  ;;  %v378_v58 = vadd.f32 %v373_v56, %v366_v54 }
 0x1c1   : > { %405 = vst.msk [vmem:[%s1080_s4] sm:$0xff] %vm380_vm2, %v402_v57  ;;  %382 = vst.msk [vmem:[%s1079_s3 + $0x8] sm:$0xff] %vm380_vm2, %v378_v58 }
 0x1c2   : > { %v401_v61 = vpop.xlane.xlu1 %400  ;;  %v398_v62 = vpop.xlane.xlu0 %397 }
 0x1c3   : > { %v404_v63 = vadd.f32 %v401_v61, %v386_v59  ;;  %v403_v0 = vadd.f32 %v398_v62, %v385_v60 }
 0x1c5   : > { %407 = vst.msk [vmem:[%s1080_s4 + $0x10] sm:$0xff] %vm380_vm2, %v404_v63  ;;  %406 = vst.msk [vmem:[%s1080_s4 + $0x8] sm:$0xff] %vm380_vm2, %v403_v0 }
 0x1c6 PF: > { %p587_p0 = scmp.ge.s32.totalorder %s753_s18, 2  ;;  %s449_s29 = sand.u32 1, %s741_s15  }
 0x1c7   : > { %p1098_p3 = scmp.ne.s32.totalorder %s1088_s28, 0  ;;  %s450_s27 = scalar_lea.sflag [#allocation4], %s449_s29 }
 0x1c9   : > { %p581_p7 = pnand %p587_p0, %p1098_p3 }
 0x1cb   : > { %p582_p8 = pneg %p581_p7 }
 0x1cd   : > { %736 = dma.done.wait (%p582_p8), %s450_s27, 768  }
 0x1ce   : > { %738 = vsyncadd (%p582_p8), %s450_s27, 4294966528  ;;  %p19_p9 = scmp.ge.s32.totalorder %s818_s21, 6   ;;  %s1099_s15 = smov %s745_s16 }
 0x1cf   : > { %s1100_s16 = smov %s749_s17  ;;  %s1101_s17 = smov %s830_s24 }
 0x1d0   : > { %s1102_s18 = smov %s818_s21  ;;  %21 = sbr.rel (!%p19_p9) target bundleno = 6 (0x6), region = 98 }
 0x1d5   :  { %455 = vsyncpa [#allocation3], 1 }
 0x1d6   :  { %457 = vsyncpa [#allocation3 + $0x1], 1 }
 0x1d7   :  { %458 = vsyncpa [#allocation6], 1 }
 0x1d8   :  { %460 = vsyncpa [#allocation6 + $0x1], 1 }
 0x1d9   :  { %461 = vsyncpa [#allocation4], 1 }
 0x1da   :  { %463 = vsyncpa [#allocation4 + $0x1], 1 }

</bundles_post_ra>
